<compile_context>
chip_gen: v5e
topology: v5e:2x2
jax: 0.10.0
libtpu: 0.0.40
codegen_flags: <defaults>
</compile_context>

<pallas_src>
import functools

import jax
import jax.numpy as jnp
from jax import lax
from jax.experimental import pallas as pl
from jax.experimental.pallas import tpu as pltpu

NEG = -1e30  # score for lane-padded tag columns -> softmax prob ~ 0


# ----------------------------------------------------------------------------
# Tiled Pallas linear:  y = x @ wT + b  (optional fused leaky relu).
# wT is stored pre-transposed (K, N) in bf16 at init; x is cast to bf16
# in-kernel so the MXU runs bf16 x bf16 with f32 accumulation.
# ----------------------------------------------------------------------------
def _linear_kernel(x_ref, wt_ref, b_ref, o_ref, *, leaky_slope):
    y = jnp.dot(x_ref[...].astype(jnp.bfloat16), wt_ref[...],
                preferred_element_type=jnp.float32)
    y = y + b_ref[...]
    if leaky_slope is not None:
        y = jnp.where(y >= 0, y, leaky_slope * y)
    o_ref[...] = y.astype(o_ref.dtype)


def pallas_linear(x, wT, b, leaky_slope=None, block_m=512, block_n=4096):
    """x: (M, K) f32, wT: (K, N) bf16, b: (1, N) f32 -> (M, N) f32."""
    M, K = x.shape
    N = wT.shape[1]
    tm = min(M, block_m)
    tn = min(N, block_n)
    return pl.pallas_call(
        functools.partial(_linear_kernel, leaky_slope=leaky_slope),
        out_shape=jax.ShapeDtypeStruct((M, N), jnp.float32),
        grid=(pl.cdiv(M, tm), pl.cdiv(N, tn)),
        in_specs=[pl.BlockSpec((tm, K), lambda i, j: (i, 0)),
                  pl.BlockSpec((K, tn), lambda i, j: (0, j)),
                  pl.BlockSpec((1, tn), lambda i, j: (0, j))],
        out_specs=pl.BlockSpec((tm, tn), lambda i, j: (i, j)),
        compiler_params=pltpu.CompilerParams(
            dimension_semantics=("parallel", "parallel")),
    )(x, wT, b)


# ----------------------------------------------------------------------------
# Fused bidirectional LSTM recurrence (both directions in one kernel call).
# xg holds the precomputed input-gate projections for both directions
# (fwd gates in lanes [0:4H), bwd gates in [4H:8H)); the backward direction
# simply indexes time as S-1-t (no HBM reversal copies).  PyTorch order i,f,g,o.
# ----------------------------------------------------------------------------
def _lstm_recurrence_kernel(xg_ref, whh_f_ref, whh_b_ref, out_ref,
                            hf, cf, hb, cb):
    S = xg_ref.shape[0]
    H = whh_f_ref.shape[0]
    G = 4 * H

    hf[...] = jnp.zeros_like(hf)
    cf[...] = jnp.zeros_like(cf)
    hb[...] = jnp.zeros_like(hb)
    cb[...] = jnp.zeros_like(cb)

    def lstm_cell(gates, c_prev):
        # TODO(synk): for large H pad H to a multiple of 128 (or use a
        # (B, 4, Hpad) gate layout) so these gate slices are lane-aligned.
        i = jax.nn.sigmoid(gates[:, 0 * H:1 * H])
        f = jax.nn.sigmoid(gates[:, 1 * H:2 * H])
        g = jnp.tanh(gates[:, 2 * H:3 * H])
        o = jax.nn.sigmoid(gates[:, 3 * H:4 * H])
        c = f * c_prev + i * g
        h = o * jnp.tanh(c)
        return h, c

    def step(t, carry):
        tb = S - 1 - t
        gf = xg_ref[t, :, 0:G] + jnp.dot(
            hf[...].astype(jnp.bfloat16), whh_f_ref[...],
            preferred_element_type=jnp.float32)
        gb = xg_ref[tb, :, G:2 * G] + jnp.dot(
            hb[...].astype(jnp.bfloat16), whh_b_ref[...],
            preferred_element_type=jnp.float32)
        h_f, c_f = lstm_cell(gf, cf[...])
        h_b, c_b = lstm_cell(gb, cb[...])
        hf[...] = h_f
        cf[...] = c_f
        hb[...] = h_b
        cb[...] = c_b
        out_ref[t, :, 0:H] = h_f            # forward half of the feature dim
        out_ref[tb, :, H:2 * H] = h_b       # backward half, reversed in time
        return carry

    lax.fori_loop(0, S, step, 0, unroll=2)


def bilstm_layer(x_tm, layer, H):
    """x_tm: (S, B, D) time-major -> (S, B, 2H) time-major ([fwd | bwd])."""
    S, B, D = x_tm.shape
    G2 = 8 * H
    # Hoisted input-gate projection for BOTH directions as one MXU matmul
    # (bias folded in).
    xg = pallas_linear(x_tm.reshape(S * B, D), layer["WihT"], layer["bias"])
    xg = xg.reshape(S, B, G2)

    # TODO(synk): for large S*B*H (v7x 64 MiB VMEM) add a time-chunk grid axis
    # with h/c carried in scratch instead of keeping the whole sequence
    # resident in VMEM.
    return pl.pallas_call(
        _lstm_recurrence_kernel,
        out_shape=jax.ShapeDtypeStruct((S, B, 2 * H), jnp.float32),
        grid=(1,),
        in_specs=[pl.BlockSpec((S, B, G2), lambda i: (0, 0, 0)),
                  pl.BlockSpec((H, 4 * H), lambda i: (0, 0)),
                  pl.BlockSpec((H, 4 * H), lambda i: (0, 0))],
        out_specs=pl.BlockSpec((S, B, 2 * H), lambda i: (0, 0, 0)),
        scratch_shapes=[pltpu.VMEM((B, H), jnp.float32),
                        pltpu.VMEM((B, H), jnp.float32),
                        pltpu.VMEM((B, H), jnp.float32),
                        pltpu.VMEM((B, H), jnp.float32)],
        compiler_params=pltpu.CompilerParams(
            dimension_semantics=("arbitrary",),
            vmem_limit_bytes=48 * 1024 * 1024),
    )(xg, layer["WhhT_f"], layer["WhhT_b"])


# ----------------------------------------------------------------------------
# Biaffine scoring + softmax + fused CrossEntropy(ignore_index=0).
#   tag[b,s,t] = sum_k hs_word[b,s,k] * Vx[b,k,t] + Vb[b,0,t]
# where V was produced by contracting W_R with the predicate vector once
# (Pallas linear, tag axis already padded to Tpad lanes with -1e30 bias).
# ----------------------------------------------------------------------------
def _biaffine_kernel(x_ref, vx_ref, vb_ref, tgt_ref, prob_ref, nll_ref):
    x = x_ref[0].astype(jnp.bfloat16)                               # (S, P)
    vx = vx_ref[0].astype(jnp.bfloat16)                             # (P, Tpad)
    tag = jnp.dot(x, vx, preferred_element_type=jnp.float32) + vb_ref[0]
    m = jnp.max(tag, axis=-1, keepdims=True)
    z = tag - m
    e = jnp.exp(z)                      # padded tag columns (-1e30 bias) -> 0
    s = jnp.sum(e, axis=-1, keepdims=True)
    prob_ref[0] = e * (1.0 / s)         # exact softmax (rows sum to 1)
    # fused CrossEntropy(ignore_index=0):  nll = log(sum exp) - z[target]
    tgt = tgt_ref[0]                                                # (S, 1)
    onehot = lax.broadcasted_iota(jnp.int32, tag.shape, 1) == tgt   # (S, Tpad)
    z_t = jnp.sum(jnp.where(onehot, z, 0.0), axis=-1, keepdims=True)
    valid = (tgt != 0).astype(jnp.float32)
    nll_ref[0] = (jnp.log(s) - z_t) * valid


def biaffine_probs_loss(hs_word, Vx, Vb, targets3):
    """hs_word:(B,S,P), Vx:(B,P,Tpad), Vb:(B,1,Tpad), targets3:(B,S,1)."""
    B, S, P = hs_word.shape
    Tpad = Vx.shape[-1]
    return pl.pallas_call(
        _biaffine_kernel,
        out_shape=(jax.ShapeDtypeStruct((B, S, Tpad), jnp.float32),
                   jax.ShapeDtypeStruct((B, S, 1), jnp.float32)),
        grid=(B,),
        in_specs=[pl.BlockSpec((1, S, P), lambda b: (b, 0, 0)),
                  pl.BlockSpec((1, P, Tpad), lambda b: (b, 0, 0)),
                  pl.BlockSpec((1, 1, Tpad), lambda b: (b, 0, 0)),
                  pl.BlockSpec((1, S, 1), lambda b: (b, 0, 0))],
        out_specs=(pl.BlockSpec((1, S, Tpad), lambda b: (b, 0, 0)),
                   pl.BlockSpec((1, S, 1), lambda b: (b, 0, 0))),
        compiler_params=pltpu.CompilerParams(
            dimension_semantics=("parallel",)),
    )(hs_word, Vx, Vb, targets3)


# ----------------------------------------------------------------------------
# Forward pass (mirrors BiLSTMTagger.forward SRL branch, eval mode)
# ----------------------------------------------------------------------------
def forward(params, sentence, p_sentence, target_idx_in, region_marks, targets):
    B, S = sentence.shape
    H = params["hidden_dim"]
    T = params["tagset_size"]
    Tpad = params["tagset_pad"]
    P = 300

    # --- embedding lookups (glue) ---
    region_emb = params["region_embeddings"][region_marks]          # (B, S, 16)
    fixed_embeds = params["word_fixed_embeddings"][p_sentence]      # (B, S, E)
    embeds_SRL = params["word_embeddings_SRL"][sentence]            # (B, S, E)
    feats = jnp.concatenate([embeds_SRL, fixed_embeds, region_emb], axis=2)
    # SRL_input_dropout / hidden_state_dropout / dropout_1/2: identity (eval).
    # TODO(synk): pack_padded_sequence / sort_batch are identities here (all
    # sequences assumed full length).

    # --- 3-layer fused-direction BiLSTM, time-major throughout ---
    h_tm = jnp.transpose(feats, (1, 0, 2))                          # (S, B, D)
    for layer in params["lstm_layers"]:
        h_tm = bilstm_layer(h_tm, layer, H)                         # (S, B, 2H)
    hidden_states_3 = jnp.transpose(h_tm, (1, 0, 2))                # (B, S, 2H)

    # --- projections (Pallas linear + fused leaky_relu 0.1) ---
    hs_word = pallas_linear(hidden_states_3.reshape(B * S, 2 * H),
                            params["Non_Predicate_Proj_wT"],
                            params["Non_Predicate_Proj_b"],
                            leaky_slope=0.1).reshape(B, S, P)
    predicate_embeds = hidden_states_3[jnp.arange(B), target_idx_in]   # (B,2H)
    hs_pred = pallas_linear(predicate_embeds,
                            params["Predicate_Proj_wT"],
                            params["Predicate_Proj_b"],
                            leaky_slope=0.1)                            # (B,P)

    # --- biaffine: contract W_R with the predicate vector once ---
    V_flat = pallas_linear(hs_pred, params["W_V_T"], params["W_V_b"])
    Vx = V_flat[:, :P * Tpad].reshape(B, P, Tpad)
    Vb = V_flat[:, P * Tpad:].reshape(B, 1, Tpad)

    probs, nll = biaffine_probs_loss(
        hs_word, Vx, Vb, targets.astype(jnp.int32).reshape(B, S, 1))
    SRLprobs = probs[:, :, :T].reshape(B * S, T)

    # CrossEntropyLoss(ignore_index=0): per-token nll already masked in-kernel.
    count = jnp.sum((targets != 0).astype(jnp.float32))
    SRLloss = jnp.sum(nll) / jnp.maximum(count, 1.0)

    wrong_l_nums = 0.0
    all_l_nums = 0.0
    right_noNull_predict = 10.0
    noNull_predict = 10.0
    noNUll_truth = 10.0
    return (SRLloss, SRLloss, SRLloss, SRLprobs, wrong_l_nums, all_l_nums,
            wrong_l_nums, all_l_nums, right_noNull_predict, noNull_predict,
            noNUll_truth, right_noNull_predict, noNull_predict, noNUll_truth)


# ----------------------------------------------------------------------------
# Deterministic parameter initialization (synthetic) with all weight
# repacking (transpose / stack / tag padding) done once here, not per forward.
# ----------------------------------------------------------------------------
def init_params(key, *, vocab_size, tagset_size, hidden_dim, word_emb_dim):
    H, E = hidden_dim, word_emb_dim
    P, P1 = 300, 301
    T = tagset_size
    Tpad = max(128, ((T + 127) // 128) * 128)
    in_srl = 2 * E + 16
    keys = iter(jax.random.split(key, 64))

    def u(shape, scale=0.1):
        return jax.random.uniform(next(keys), shape, jnp.float32, -scale, scale)

    params = {
        "hidden_dim": H,
        "tagset_size": T,
        "tagset_pad": Tpad,
        "word_emb_dim": E,
        "word_embeddings_SRL": u((vocab_size, E), 1.0),
        "word_fixed_embeddings": u((vocab_size, E), 1.0),  # hps['word_embeddings']
        "region_embeddings": u((2, 16), 1.0),
    }

    # Projections, stored pre-transposed (K, N) with bf16 MXU weights.
    np_w, np_b = u((P, 2 * H)), u((P,))
    pp_w, pp_b = u((P, 2 * H)), u((P,))
    params["Non_Predicate_Proj_wT"] = np_w.T.astype(jnp.bfloat16)
    params["Non_Predicate_Proj_b"] = np_b.reshape(1, P)
    params["Predicate_Proj_wT"] = pp_w.T.astype(jnp.bfloat16)
    params["Predicate_Proj_b"] = pp_b.reshape(1, P)

    # Biaffine W_R = torch.rand(301, T*301), repacked once into the "V-linear"
    # layout:  V[b, k*Tpad + t] = sum_j p[b,j] * W_R[k, t*301 + j] + W_R[k, t*301 + 300]
    # with zero weight columns for padded tags and -1e30 on the constant row.
    W_R = jax.random.uniform(next(keys), (P1, T * P1), jnp.float32, 0.0, 1.0)
    W3 = W_R.reshape(P1, T, P1)                                   # [k, t, j]
    Wx = jnp.transpose(W3[:, :, :P], (2, 0, 1))                   # (P, P1, T)
    Wx = jnp.pad(Wx, ((0, 0), (0, 0), (0, Tpad - T)))             # (P, P1, Tpad)
    params["W_V_T"] = Wx.reshape(P, P1 * Tpad).astype(jnp.bfloat16)
    bV = jnp.pad(W3[:, :, P], ((0, 0), (0, Tpad - T)))            # (P1, Tpad)
    bV = bV.at[P, T:].set(NEG)
    params["W_V_b"] = bV.reshape(1, P1 * Tpad)

    # 3-layer BiLSTM (PyTorch gate order i,f,g,o), pre-stacked / pre-transposed.
    layers = []
    for l in range(3):
        d_in = in_srl if l == 0 else 2 * H
        Wih_f, Whh_f, bih_f, bhh_f = (u((4 * H, d_in)), u((4 * H, H)),
                                      u((4 * H,)), u((4 * H,)))
        Wih_b, Whh_b, bih_b, bhh_b = (u((4 * H, d_in)), u((4 * H, H)),
                                      u((4 * H,)), u((4 * H,)))
        layers.append({
            "WihT": jnp.concatenate([Wih_f.T, Wih_b.T],
                                    axis=1).astype(jnp.bfloat16),   # (d_in, 8H)
            "bias": jnp.concatenate([bih_f + bhh_f,
                                     bih_b + bhh_b]).reshape(1, 8 * H),
            "WhhT_f": Whh_f.T.astype(jnp.bfloat16),                 # (H, 4H)
            "WhhT_b": Whh_b.T.astype(jnp.bfloat16),
        })
    params["lstm_layers"] = layers
    return params


if __name__ == "__main__":
    B, S = 2, 8
    H, E = 32, 32
    vocab_size, tagset_size = 100, 10

    key = jax.random.PRNGKey(0)
    pkey, dkey = jax.random.split(key)
    params = init_params(pkey, vocab_size=vocab_size, tagset_size=tagset_size,
                         hidden_dim=H, word_emb_dim=E)

    k1, k2, k3, k4, k5 = jax.random.split(dkey, 5)
    sentence = jax.random.randint(k1, (B, S), 0, vocab_size)
    p_sentence = jax.random.randint(k2, (B, S), 0, vocab_size)
    region_marks = jax.random.randint(k3, (B, S), 0, 2)
    target_idx_in = jax.random.randint(k4, (B,), 0, S)
    targets = jax.random.randint(k5, (B, S), 0, tagset_size)

    out = forward(params, sentence, p_sentence, target_idx_in,
                  region_marks, targets)
    jax.block_until_ready((out[0], out[3]))
    print("KERNEL_OK")
</pallas_src>

<mosaic_0001>
module attributes {stable_mosaic.version = 11 : i64} {
  func.func @_linear_kernel(%arg0: i32, %arg1: i32, %arg2: memref<16x80xf32, #tpu.memory_space<vmem>>, %arg3: memref<80x256xbf16, #tpu.memory_space<vmem>>, %arg4: memref<1x256xf32, #tpu.memory_space<vmem>>, %arg5: memref<16x256xf32, #tpu.memory_space<vmem>>) attributes {dimension_semantics = [#tpu.dimension_semantics<parallel>, #tpu.dimension_semantics<parallel>], iteration_bounds = array<i64: 1, 1>, scalar_prefetch = 0 : i64, scratch_operands = 0 : i64, tpu.core_type = #tpu.core_type<tc>, window_params = [{transform_indices = @transform_0, window_bounds = array<i64: 16, 80>}, {transform_indices = @transform_1, window_bounds = array<i64: 80, 256>}, {transform_indices = @transform_2, window_bounds = array<i64: 1, 256>}, {transform_indices = @transform_3, window_bounds = array<i64: 16, 256>}]} {
    %c0 = arith.constant 0 : index
    %c0_0 = arith.constant 0 : index
    %0 = vector.load %arg2[%c0, %c0_0] : memref<16x80xf32, #tpu.memory_space<vmem>>, vector<16x80xf32>
    %1 = arith.truncf %0 : vector<16x80xf32> to vector<16x80xbf16>
    %c0_1 = arith.constant 0 : index
    %c0_2 = arith.constant 0 : index
    %2 = vector.load %arg3[%c0_1, %c0_2] : memref<80x256xbf16, #tpu.memory_space<vmem>>, vector<80x256xbf16>
    %cst = arith.constant dense<0.000000e+00> : vector<16x256xf32>
    %3 = tpu.matmul %1, %2, %cst {dimension_numbers = #tpu.dot_dimension_numbers<[1], [0], [0], [1], [0, 0, 1, 1], [], []>} : vector<16x80xbf16>, vector<80x256xbf16>, vector<16x256xf32> -> vector<16x256xf32>
    %c0_3 = arith.constant 0 : index
    %c0_4 = arith.constant 0 : index
    %4 = vector.load %arg4[%c0_3, %c0_4] : memref<1x256xf32, #tpu.memory_space<vmem>>, vector<1x256xf32>
    %5 = vector.broadcast %4 : vector<1x256xf32> to vector<16x256xf32>
    %6 = arith.addf %3, %5 : vector<16x256xf32>
    %c0_5 = arith.constant 0 : index
    %c0_6 = arith.constant 0 : index
    %7 = vector.load %arg5[%c0_5, %c0_6] : memref<16x256xf32, #tpu.memory_space<vmem>>, vector<16x256xf32>
    tpu.vector_store %arg5[%c0_5, %c0_6], %6 {strides = array<i32>} : memref<16x256xf32, #tpu.memory_space<vmem>>, vector<16x256xf32>,
    return
  }
  func.func @transform_0(%arg0: i32, %arg1: i32) -> (i32, i32) {
    %c0_i32 = arith.constant 0 : i32
    %c0_i32_0 = arith.constant 0 : i32
    return %arg0, %c0_i32 : i32, i32
  }
  func.func @transform_1(%arg0: i32, %arg1: i32) -> (i32, i32) {
    %c0_i32 = arith.constant 0 : i32
    %c0_i32_0 = arith.constant 0 : i32
    return %c0_i32, %arg1 : i32, i32
  }
  func.func @transform_2(%arg0: i32, %arg1: i32) -> (i32, i32) {
    %c0_i32 = arith.constant 0 : i32
    %c0_i32_0 = arith.constant 0 : i32
    return %c0_i32, %arg1 : i32, i32
  }
  func.func @transform_3(%arg0: i32, %arg1: i32) -> (i32, i32) {
    %c0_i32 = arith.constant 0 : i32
    return %arg0, %arg1 : i32, i32
  }
}

</mosaic_0001>

<bundles_post_ra>
// kernel: tpu_custom_call.1
= control target key start
LH: loop header
LB: loop body
LE: loop exit
PB: predicated region body
PF: predicated region fallthrough
CT: control target
= control target key end

     0   :  { %8 = vsyncpa [#allocation3], 0  ;;  %s388_s0 = inlined_call_operand.hbm [shape: f32[16,80], index: 0, kind: input, shape index: {}]   ;;  %s389_s1 = inlined_call_operand.hbm [shape: bf16[80,256], index: 1, kind: input, shape index: {}]   ;;  %s390_s2 = inlined_call_operand.hbm [shape: f32[1,256], index: 2, kind: input, shape index: {}]   ;;  %s391_s3 = inlined_call_operand.hbm [shape: f32[16,256], index: 3, kind: output, shape index: {}]  }
   0x1   :  { %9 = vsyncpa [#allocation6], 0 }
   0x2   :  { %10 = vsyncpa [#allocation4], 0  ;;  %s28_s14 = sshll.u32 %s389_s1, 4  ;;  %s348_s15 = smov [#allocation5]   ;;  %s29_s14 = int_to_ptr.hbm [resolvable:$true] %s28_s14 }
   0x3   :  { %s30_s16 = sshll.u32 %s348_s15, 4  ;;  %s15_s19 = sshll.u32 %s388_s0, 4  ;;  %s31_s16 = int_to_ptr.vmem [resolvable:$true] %s30_s16  ;;  %s16_s19 = int_to_ptr.hbm [resolvable:$true] %s15_s19 }
   0x4   :  { %s349_s20 = smov 128   ;;  %s350_s21 = smov 8  }
   0x5   :  { %36 = dma.hbm_to_vmem [thread:$0]  %s29_s14, 1280, %s31_s16, [#allocation6], %s349_s20, %s349_s20, %s350_s21  }
   0x6   :  { %s351_s22 = smov [#allocation2]   ;;  %s42_s26 = sshll.u32 %s390_s2, 4  ;;  %s43_s26 = int_to_ptr.hbm [resolvable:$true] %s42_s26 }
   0x7   :  { %s17_s23 = sshll.u32 %s351_s22, 4  ;;  %s352_s1 = smov [#allocation7]   ;;  %s18_s23 = int_to_ptr.vmem [resolvable:$true] %s17_s23 }
   0x8   :  { %23 = dma.hbm_to_vmem [thread:$0]  %s16_s19, 256, %s18_s23, [#allocation3], %s349_s20, %s349_s20, %s350_s21  }
   0x9   :  { %s44_s27 = sshll.u32 %s352_s1, 4  ;;  %s45_s27 = int_to_ptr.vmem [resolvable:$true] %s44_s27 }
   0xa   :  { %47 = dma.hbm_to_vmem [thread:$0]  %s43_s26, 32, %s45_s27, [#allocation6]  }
   0xb   :  { %342 = dma.done.wait [#allocation3], 256  }
   0xc   :  { %343 = vsyncadd [#allocation3], 4294967040 }
   0xd   :  { %344 = dma.done.wait [#allocation6], 1312  }
   0xe   :  { %345 = vsyncadd [#allocation6], 4294965984  ;;  %v220_v0 = vld [vmem:[#allocation5 + $0x40] sm:$0xf]  ;;  %v237_v1 = vld [vmem:[#allocation5 + $0x44] sm:$0xf0] }
   0xf   :  { %v236_v2 = vld [vmem:[#allocation5 + $0x44] sm:$0xf]  ;;  %v221_v3 = vor.u32 %v237_v1, %v220_v0  ;;  %v222_v4 = vld [vmem:[#allocation5 + $0x48] sm:$0xf0]  ;;  %v212_v5 = vld [vmem:[#allocation5 + $0x30] sm:$0xf] }
  0x10   :  { %v235_v6 = vld [vmem:[#allocation5 + $0x34] sm:$0xf0]  ;;  %v225_v7 = vor.u32 %v236_v2, %v222_v4  ;;  %v234_v8 = vld [vmem:[#allocation5 + $0x34] sm:$0xf]  ;;  %v214_v9 = vld [vmem:[#allocation5 + $0x38] sm:$0xf0] }
  0x11   :  { %137 = vmatpush.bf16.msra.mxu0 %v221_v3  ;;  %v213_v10 = vor.u32 %v235_v6, %v212_v5  ;;  %v217_v11 = vor.u32 %v234_v8, %v214_v9  ;;  %v204_v12 = vld [vmem:[#allocation5 + $0x20] sm:$0xf]  ;;  %v233_v13 = vld [vmem:[#allocation5 + $0x24] sm:$0xf0]  ;;  %v232_v14 = vld [vmem:[#allocation5 + $0x24] sm:$0xf] }
  0x12   :  { %151 = vmatpush.bf16.msra.mxu1 %v225_v7  ;;  %v206_v15 = vld [vmem:[#allocation5 + $0x28] sm:$0xf0]  ;;  %v205_v16 = vor.u32 %v233_v13, %v204_v12  ;;  %v196_v18 = vld [vmem:[#allocation5 + $0x10] sm:$0xf]  ;;  %v231_v19 = vld [vmem:[#allocation5 + $0x14] sm:$0xf0] }
  0x13   :  { %v209_v17 = vor.u32 %v232_v14, %v206_v15  ;;  %v230_v20 = vld [vmem:[#allocation5 + $0x14] sm:$0xf]  ;;  %v198_v21 = vld [vmem:[#allocation5 + $0x18] sm:$0xf0]  ;;  %v197_v22 = vor.u32 %v231_v19, %v196_v18  ;;  %v188_v24 = vld [vmem:[#allocation5] sm:$0xf] }
  0x14   :  { %v201_v23 = vor.u32 %v230_v20, %v198_v21  ;;  %v229_v25 = vld [vmem:[#allocation5 + $0x4] sm:$0xf0]  ;;  %v228_v26 = vld [vmem:[#allocation5 + $0x4] sm:$0xf]  ;;  %v190_v27 = vld [vmem:[#allocation5 + $0x8] sm:$0xf0] }
  0x15   :  { %138 = vmatpush.bf16.msra.mxu0 %v213_v10  ;;  %v189_v28 = vor.u32 %v229_v25, %v188_v24  ;;  %v61_v29 = vld [vmem:[#allocation2] sm:$0xff]  ;;  %v62_v30 = vld [vmem:[#allocation2 + $0x8] sm:$0xff]  ;;  %v193_v31 = vor.u32 %v228_v26, %v190_v27  ;;  %vm130_vm0 = vcmask 654336   ;;  %s353_s0 = smov [#allocation8]   ;;  %s172_s30 = sshll.u32 %s391_s3, 4  ;;  %s173_s30 = int_to_ptr.hbm [resolvable:$true] %s172_s30 }
  0x16   :  { %152 = vmatpush.bf16.msra.mxu1 %v217_v11  ;;  %v63_v32 = vpack.c.bf16 %v62_v30, %v61_v29  ;;  %v74_v33 = vld [vmem:[#allocation7] sm:$0x3]  ;;  %s170_s2 = sshll.u32 %s353_s0, 4  ;;  %s354_s4 = smov 256   ;;  %s171_s2 = int_to_ptr.vmem [resolvable:$true] %s170_s2 }
  0x17   :  { %v76_v34 = vperm.slane %v74_v33, 0  ;;  %v77_v35 = vperm.slane %v74_v33, 1  ;;  %s355_s5 = smov 16  }
  0x19   :  { %139 = vmatpush.bf16.msra.mxu0 %v205_v16 }
  0x1a   :  { %153 = vmatpush.bf16.msra.mxu1 %v209_v17 }
  0x1d   :  { %140 = vmatpush.bf16.msra.mxu0 %v197_v22 }
  0x1e   :  { %154 = vmatpush.bf16.msra.mxu1 %v201_v23 }
  0x21   :  { %141 = vmatpush.bf16.msra.mxu0 %v189_v28 }
  0x22   :  { %155 = vmatpush.bf16.msra.mxu1 %v193_v31 }
  0x24   :  { %226 = vmatmul.msk.bf16.vlgmr.msra.gmra.mxu0 %vm130_vm0, %v63_v32 }
  0x25   :  { %227 = vmatmul.msk.bf16.vlgmr.msra.gmra.mxu1 %vm130_vm0, %v63_v32 }
  0xa1   :  { %v143_v36 = vpop.f32.mrf.mxu0 }
  0xa2   :  { %v144_v37 = vadd.f32 %v143_v36, %v76_v34  ;;  %v157_v38 = vpop.f32.mrf.mxu1 }
  0xa3   :  { %v158_v39 = vadd.f32 %v157_v38, %v77_v35 }
  0xa4   :  { %162 = vst [vmem:[#allocation8] sm:$0xff] %v144_v37 }
  0xa5   :  { %163 = vst [vmem:[#allocation8 + $0x8] sm:$0xff] %v158_v39 }
  0xa9   :  { %v145_v40 = vpop.f32.mrf.mxu0 }
  0xaa   :  { %v146_v41 = vadd.f32 %v145_v40, %v76_v34  ;;  %v159_v42 = vpop.f32.mrf.mxu1 }
  0xab   :  { %v160_v43 = vadd.f32 %v159_v42, %v77_v35 }
  0xac   :  { %164 = vst [vmem:[#allocation8 + $0x10] sm:$0xff] %v146_v41 }
  0xad   :  { %165 = vst [vmem:[#allocation8 + $0x18] sm:$0xff] %v160_v43 }
  0xae   :  { %178 = dma.vmem_to_hbm [thread:$0]  %s171_s2, 512, %s173_s30, [#allocation4], %s354_s4, %s354_s4, %s355_s5  }
  0xaf   :  { %346 = dma.done.wait [#allocation4], 512  }
  0xb0   :  { %347 = vsyncadd [#allocation4], 4294966784 }
  0xb1   :  { %183 = vsyncpa [#allocation3], 1 }
  0xb2   :  { %184 = vsyncpa [#allocation6], 1 }
  0xb3   :  { %185 = vsyncpa [#allocation4], 1 }

</bundles_post_ra>
